<compile_context>
chip_gen: v7x
topology: tpu7x:2x2x1
jax: 0.10.0
libtpu: 0.0.40
codegen_flags: <defaults>
</compile_context>

<pallas_src>
import jax
import jax.numpy as jnp
import numpy as np
from jax.experimental import pallas as pl
from jax.experimental.pallas import tpu as pltpu


def _round_up(x, m):
    return ((x + m - 1) // m) * m


def bernoulli_encoder_kernel(fx_ref, p_ref, out_ref):
    # fx_ref : (tile_b, 1)      VMEM, precomputed f(x) = s*x + (1-s)*log(x), f32
    # p_ref  : (3, tile_n)      VMEM, rows = [inv_sigmas ; 2*cs*inv_sigmas ;
    #                                         -(cs^2)*inv_sigmas + log(As)]
    # out_ref: (tile_b, tile_n) VMEM
    f_x = fx_ref[...]                       # (tB, 1)
    p = p_ref[...]                          # (3, tN)
    k0 = p[0:1, :]                          # inv_sigmas
    k1 = p[1:2, :]                          # 2 * cs * inv_sigmas
    k2 = p[2:3, :]                          # -(cs^2)*inv_sigmas + log(As)

    # Same additive order as the PyTorch forward: etas1 + etas2 + etas3.
    out = -(f_x * f_x) * k0 + f_x * k1 + k2
    out_ref[...] = out.astype(out_ref.dtype)


def bernoulli_encoder_gln(x, alpha, cs, log_sigmas, As, *,
                          out_dtype=jnp.float32,
                          max_tile_b=1024, max_tile_n=2048):
    """Forward pass of BernoulliEncoderGLN.

    x:          (B, 1) strictly positive
    alpha:      scalar parameter
    cs, log_sigmas, As: (1, N) parameters
    returns:    (B, N) logits, dtype `out_dtype`
    """
    assert max_tile_b % 8 == 0 and max_tile_n % 128 == 0
    B = x.shape[0]
    N = cs.shape[-1]

    x_f = x.astype(jnp.float32).reshape(B, 1)
    cs_f = cs.astype(jnp.float32).reshape(1, N)
    ls_f = log_sigmas.astype(jnp.float32).reshape(1, N)
    As_f = As.astype(jnp.float32).reshape(1, N)

    # Hoisted O(B)+O(N) precompute (the grid would otherwise recompute sigmoid /
    # exp / log on every step; the kernel body is now transcendental-free).
    s = jax.nn.sigmoid(jnp.asarray(alpha, jnp.float32))
    f_x = s * x_f + (1.0 - s) * jnp.log(x_f)                         # (B, 1)
    inv_sigmas = 0.5 * jnp.exp(-2.0 * ls_f)                          # (1, N)
    k0 = inv_sigmas
    k1 = 2.0 * (cs_f * inv_sigmas)
    k2 = -(cs_f * cs_f) * inv_sigmas + jnp.log(As_f)
    params = jnp.concatenate([k0, k1, k2], axis=0)                   # (3, N)

    # Lane/sublane-aligned tile sizes; output tile up to ~8 MiB to amortize the
    # per-grid-step overhead.  No padding of the arrays: Pallas clips edge blocks.
    tile_b = min(_round_up(B, 8), max_tile_b)
    tile_n = min(_round_up(N, 128), max_tile_n)
    grid_n = pl.cdiv(N, tile_n)
    grid_b = pl.cdiv(B, tile_b)

    out_itemsize = np.dtype(out_dtype).itemsize
    # Double-buffered footprint (out + f_x + params tiles) with 2x headroom,
    # clamped so it stays safe on v7x's 64 MiB physical VMEM.
    tile_bytes = 2 * (tile_b * tile_n * out_itemsize + tile_b * 4 + 3 * tile_n * 4)
    vmem_limit = int(min(max(2 * tile_bytes, 4 << 20), 48 << 20))

    cost = pl.CostEstimate(
        flops=5 * B * N,
        transcendentals=0,
        bytes_accessed=B * N * out_itemsize + B * 4 + 3 * N * 4,
    )

    out = pl.pallas_call(
        bernoulli_encoder_kernel,
        out_shape=jax.ShapeDtypeStruct((B, N), out_dtype),
        grid=(grid_n, grid_b),                       # N outer, B inner
        in_specs=[
            pl.BlockSpec((tile_b, 1), lambda j, i: (i, 0)),     # f_x
            pl.BlockSpec((3, tile_n), lambda j, i: (0, j)),     # stacked coefficients
        ],
        out_specs=pl.BlockSpec((tile_b, tile_n), lambda j, i: (i, j)),
        compiler_params=pltpu.CompilerParams(
            dimension_semantics=("parallel", "parallel"),
            vmem_limit_bytes=vmem_limit,
        ),
        cost_estimate=cost,
    )(f_x, params)

    return out


def init_bernoulli_params(N, xs, alpha=0.0, w=1.0):
    """Deterministic stand-in for initialize_bernoulli_params.

    The original uses sklearn KMeans on the transformed data to pick centers.
    Here we use evenly spaced centers over the transformed data range (already
    sorted, so the inverse-sort permutation `idr` is the identity) and keep the
    same deltac / log_sigmas / As construction.
    """
    # TODO(synk): sklearn KMeans (init-time only) replaced by deterministic linspace centers.
    s = jax.nn.sigmoid(jnp.float32(alpha))
    f_xs = s * xs + (1.0 - s) * jnp.log(xs)
    lo, hi = jnp.min(f_xs), jnp.max(f_xs)
    centers = jnp.linspace(lo, hi, N)                            # sorted
    cs = centers[None, :].astype(jnp.float32)                    # (1, N)

    deltac = jnp.diff(centers)                                   # (N-1,)
    deltac = jnp.concatenate([deltac, deltac[-1:]])              # (N,)
    log_sigmas = jnp.log(jnp.sqrt(w * deltac))[None, :].astype(jnp.float32)  # (1, N)
    As = jnp.ones((1, N), jnp.float32)                           # (1, N)
    return cs, log_sigmas, As


if __name__ == "__main__":
    B, N = 16, 200
    alpha_val = 0.0

    key = jax.random.PRNGKey(0)
    kx, kd = jax.random.split(key)
    # x must be strictly positive (log(x) in the forward).
    x = jax.random.uniform(kx, (B, 1), jnp.float32, minval=0.5, maxval=3.0)
    xs = jax.random.uniform(kd, (256,), jnp.float32, minval=0.5, maxval=3.0)

    cs, log_sigmas, As = init_bernoulli_params(N, xs, alpha=alpha_val)
    alpha = jnp.float32(alpha_val)

    # Plain-JAX reference mirroring the PyTorch forward.  The (B,1)@(1,N) matmuls
    # contain no reduction, so the broadcast form below is the exact f32 computation
    # (an actual jnp matmul would go through the TPU MXU's bf16 path and caused the
    # previous spurious mismatch).
    s = jax.nn.sigmoid(jnp.float32(alpha_val))
    f_x = s * x + (1.0 - s) * jnp.log(x)
    inv_sigmas = 0.5 * jnp.exp(-2.0 * log_sigmas)
    ref = (-(f_x ** 2) * inv_sigmas
           + (2.0 * f_x) * (cs * inv_sigmas)
           + (-(cs ** 2) * inv_sigmas + jnp.log(As)))
    ref = np.asarray(ref)

    # Small tile caps -> real 2x2 grid with a partial edge block along N (200 % 128 != 0).
    out_small = bernoulli_encoder_gln(x, alpha, cs, log_sigmas, As,
                                      max_tile_b=8, max_tile_n=128)
    out_small = jax.block_until_ready(out_small)
    assert out_small.shape == (B, N)
    assert np.allclose(np.asarray(out_small), ref, rtol=1e-5, atol=1e-4)

    # Default (large) tile caps -> single block covering the whole (B, N) output.
    out_big = bernoulli_encoder_gln(x, alpha, cs, log_sigmas, As)
    out_big = jax.block_until_ready(out_big)
    assert out_big.shape == (B, N)
    assert np.allclose(np.asarray(out_big), ref, rtol=1e-5, atol=1e-4)

    # bf16 output path: f32 math in-kernel, cast only at the store.
    out_bf16 = bernoulli_encoder_gln(x, alpha, cs, log_sigmas, As,
                                     out_dtype=jnp.bfloat16)
    out_bf16 = jax.block_until_ready(out_bf16)
    assert out_bf16.dtype == jnp.bfloat16
    assert np.allclose(np.asarray(out_bf16, np.float32), ref, rtol=2e-2, atol=1.0)

    print("KERNEL_OK")
</pallas_src>

<mosaic_0001>
module attributes {stable_mosaic.version = 11 : i64} {
  func.func @bernoulli_encoder_kernel(%arg0: i32, %arg1: i32, %arg2: memref<8x1xf32, #tpu.memory_space<vmem>>, %arg3: memref<3x128xf32, #tpu.memory_space<vmem>>, %arg4: memref<8x128xf32, #tpu.memory_space<vmem>>) attributes {dimension_semantics = [#tpu.dimension_semantics<parallel>, #tpu.dimension_semantics<parallel>], iteration_bounds = array<i64: 2, 2>, scalar_prefetch = 0 : i64, scratch_operands = 0 : i64, tpu.core_type = #tpu.core_type<tc>, window_params = [{transform_indices = @transform_0, window_bounds = array<i64: 8, 1>}, {transform_indices = @transform_1, window_bounds = array<i64: 3, 128>}, {transform_indices = @transform_2, window_bounds = array<i64: 8, 128>}]} {
    %c0 = arith.constant 0 : index
    %c0_0 = arith.constant 0 : index
    %0 = vector.load %arg2[%c0, %c0_0] : memref<8x1xf32, #tpu.memory_space<vmem>>, vector<8x1xf32>
    %c0_1 = arith.constant 0 : index
    %c0_2 = arith.constant 0 : index
    %1 = vector.load %arg3[%c0_1, %c0_2] : memref<3x128xf32, #tpu.memory_space<vmem>>, vector<3x128xf32>
    %2 = vector.extract_strided_slice %1 {offsets = [0, 0], sizes = [1, 128], strides = [1, 1]} : vector<3x128xf32> to vector<1x128xf32>
    %3 = vector.extract_strided_slice %1 {offsets = [1, 0], sizes = [1, 128], strides = [1, 1]} : vector<3x128xf32> to vector<1x128xf32>
    %4 = vector.extract_strided_slice %1 {offsets = [2, 0], sizes = [1, 128], strides = [1, 1]} : vector<3x128xf32> to vector<1x128xf32>
    %5 = arith.mulf %0, %0 : vector<8x1xf32>
    %cst = arith.constant 0.000000e+00 : f32
    %6 = vector.broadcast %cst : f32 to vector<8x1xf32>
    %7 = arith.subf %6, %5 : vector<8x1xf32>
    %8 = vector.broadcast %7 : vector<8x1xf32> to vector<8x128xf32>
    %9 = vector.broadcast %2 : vector<1x128xf32> to vector<8x128xf32>
    %10 = arith.mulf %8, %9 : vector<8x128xf32>
    %11 = vector.broadcast %0 : vector<8x1xf32> to vector<8x128xf32>
    %12 = vector.broadcast %3 : vector<1x128xf32> to vector<8x128xf32>
    %13 = arith.mulf %11, %12 : vector<8x128xf32>
    %14 = arith.addf %10, %13 : vector<8x128xf32>
    %15 = vector.broadcast %4 : vector<1x128xf32> to vector<8x128xf32>
    %16 = arith.addf %14, %15 : vector<8x128xf32>
    %c0_3 = arith.constant 0 : index
    %c0_4 = arith.constant 0 : index
    %17 = vector.load %arg4[%c0_3, %c0_4] : memref<8x128xf32, #tpu.memory_space<vmem>>, vector<8x128xf32>
    tpu.vector_store %arg4[%c0_3, %c0_4], %16 {strides = array<i32>} : memref<8x128xf32, #tpu.memory_space<vmem>>, vector<8x128xf32>,
    return
  }
  func.func @transform_0(%arg0: i32, %arg1: i32) -> (i32, i32) {
    %c0_i32 = arith.constant 0 : i32
    %c0_i32_0 = arith.constant 0 : i32
    return %arg1, %c0_i32 : i32, i32
  }
  func.func @transform_1(%arg0: i32, %arg1: i32) -> (i32, i32) {
    %c0_i32 = arith.constant 0 : i32
    %c0_i32_0 = arith.constant 0 : i32
    return %c0_i32, %arg0 : i32, i32
  }
  func.func @transform_2(%arg0: i32, %arg1: i32) -> (i32, i32) {
    %c0_i32 = arith.constant 0 : i32
    return %arg1, %arg0 : i32, i32
  }
}

</mosaic_0001>

<bundles_post_ra>
// kernel: tpu_custom_call.1
= control target key start
LH: loop header
LB: loop body
LE: loop exit
PB: predicated region body
PF: predicated region fallthrough
CT: control target
= control target key end

     0   :  { %7 = vsyncpa [#allocation3], 0  ;;  %s640_s0 = inlined_call_operand.vmem [shape: f32[16,1], index: 0, kind: input, shape index: {}]   ;;  %s641_s1 = inlined_call_operand.vmem [shape: f32[3,200], index: 1, kind: input, shape index: {}]   ;;  %s642_s2 = inlined_call_operand.hbm [shape: f32[16,200], index: 2, kind: output, shape index: {}]  }
   0x1   :  { %9 = vsyncpa [#allocation3 + $0x1], 0  ;;  %s500_s9 = smov 0   ;;  %s502_s10 = smov 0  }
   0x2   :  { %s504_s11 = smov 0   ;;  %s506_s12 = smov 0  }
   0x3   :  { %s508_s13 = smov 0   ;;  %s510_s14 = smov 0  }
   0x4   :  { %s512_s15 = smov 0   ;;  %s514_s16 = smov 0  }
   0x5 LB: > { %s301_s17 = sadd.s32 4294967295, %s481_s16   ;;  %s302_s18 = sadd.s32 4294967294, %s481_s16   ;;  %s481_s16 = sphi %s514_s16, %s15_s16   ;;  %s477_s15 = sphi %s512_s15, %s651_s15   ;;  %s473_s14 = sphi %s510_s14, %s650_s14   ;;  %s469_s13 = sphi %s508_s13, %s649_s13   ;;  %s465_s12 = sphi %s506_s12, %s648_s12   ;;  %s461_s11 = sphi %s504_s11, %s647_s11   ;;  %s457_s10 = sphi %s502_s10, %s646_s10   ;;  %s453_s9 = sphi %s500_s9, %s645_s9  }
   0x6   : > { %s24_s19 = sadd.s32 1, %s473_s14  ;;  %s27_s20 = sadd.s32 1, %s477_s15 }
   0x7   : > { %p25_p0 = scmp.ge.s32.totalorder %s24_s19, 2  ;;  %p98_p1 = scmp.ne.s32.totalorder %s461_s11, %s457_s10 }
   0x8   : > { %p99_p2 = scmp.eq.s32.totalorder %s301_s17, 3  ;;  %p104_p5 = scmp.ne.s32.totalorder %s457_s10, %s453_s9 }
   0x9   : > { %s653_s19 = smov (%p25_p0, %s24_s19), 0  ;;  %s655_s20 = smov (!%p25_p0, %s27_s20), %s477_s15 }
   0xa   : > { %s83_s21 = ssub.s32 %s473_s14, %s653_s19  ;;  %p551_p3 = por %p99_p2, %p98_p1 }
   0xb   : > { %p29_p4 = scmp.ge.s32.totalorder %s655_s20, 2  ;;  %p105_p6 = scmp.eq.s32.totalorder %s302_s18, 3 }
   0xc   : > { %p305_p7 = scmp.ge.s32.totalorder %s481_s16, 1  ;;  %p137_p9 = scmp.lt.s32.totalorder %s481_s16, 5 }
   0xd   : > { %s657_s20 = smov (%p29_p4, %s655_s20), 0  ;;  %p560_p8 = por %p105_p6, %p104_p5 }
   0xe   : > { %s84_s24 = ssub.s32 %s477_s15, %s657_s20  ;;  %s88_s25 = sadd.s32 1, %s461_s11 }
   0xf   : > { %s85_s26 = sor.u32 %s84_s24, %s83_s21  ;;  %p138_p10 = pnand %p305_p7, %p137_p9 }
  0x10   : > { %p86_p11 = scmp.eq.s32.totalorder %s85_s26, 0  ;;  %p162_p12 = scmp.lt.s32.totalorder (!%p138_p10), %s465_s12, 1  ;;  %v483_v0 = vmov (!%p138_p10), 0   ;;  %v179_v4 = vlaneseq (!%p138_p10) }
  0x11   : > { %141 = sbr.rel (%p138_p10) target bundleno = 185 (0xb9), region = 28  ;;  %386 = vset.pattern.permute.xlu0 (!%p138_p10), %v483_v0  ;;  %p166_p13 = scmp.lt.s32.totalorder (!%p138_p10), %s469_s13, 1 }
  0x12   : > { %s569_s27 = scalar_select %p86_p11, %s461_s11, %s88_s25  }
  0x13   : > { %v180_v5 = vshrl.u32 (!%p138_p10), %v179_v4, 7  ;;  %s159_s18 = sand.u32 (!%p138_p10), 1, %s457_s10   ;;  %s310_s24 = sshll.u32 (!%p138_p10), %s465_s12, 1 }
  0x14   : > { %s306_s21 = sshll.u32 (!%p138_p10), %s159_s18, 3  ;;  %s213_s25 = sadd.s32 (!%p138_p10), %s469_s13, %s310_s24 }
  0x15   : > { %v181_v6 = vsub.s32 (!%p138_p10), 0, %v180_v5  ;;  %v191_v7 = vsub.s32 (!%p138_p10), 1, %v180_v5  ;;  %v197_v12 = vsub.s32 (!%p138_p10), 2, %v180_v5  ;;  %s311_s26 = sshll.u32 (!%p138_p10), %s213_s25, 7 }
  0x18   : > { %s163_s28 = scalar_select %p162_p12, %s465_s12, 1 }
  0x19   : > { %s167_s5 = scalar_select %p166_p13, %s469_s13, 1 }
  0x1a   : > { %s307_s29 = sshll.u32 %s163_s28, 3  ;;  %s161_s28 = scalar_lea.vmem [#allocation2], %s306_s21 }
  0x1b   : > { %s165_s4 = scalar_lea.vmem %s640_s0, %s307_s29  ;;  %s308_s6 = sshll.u32 %s167_s5, 2 }
  0x1c   : > { %v170_v1 = vld [vmem:[%s165_s4] sm:$0xff]  ;;  %s169_s17 = scalar_lea.vmem %s641_s1, %s308_s6  ;;  %s217_s29 = sshll.u32 %s161_s28, 4  ;;  %s589_s29 = int_to_ptr.vmem [resolvable:$true] %s217_s29 }
  0x1d   : > { %v172_v2 = vmul.f32 %v170_v1, %v170_v1  ;;  %v171_v8 = vld [vmem:[%s169_s17] sm:$0x7]  ;;  %s587_s4 = scalar_lea.hbm %s642_s2, %s311_s26  ;;  %s202_s12 = scalar_lea.sflag [#allocation3], %s159_s18 }
  0x1e   : > { %v182_v10 = vrot.slane %v171_v8, %v181_v6  ;;  %v192_v11 = vrot.slane %v171_v8, %v191_v7  ;;  %v198_v15 = vrot.slane %v171_v8, %v197_v12  ;;  %s387_s13 = scalar_lea.vmem %s589_s29, 128  ;;  %s484_s5 = smov [#allocation2]  }
  0x1f   : > { %v173_v3 = vsub.f32 0.0, %v172_v2  ;;  %p388_p0 = scmp.ne.s32.totalorder %s589_s29, %s387_s13  ;;  %s391_s6 = sshll.u32 %s484_s5, 4  ;;  %s392_s6 = int_to_ptr.vmem [resolvable:$false] %s391_s6 }
  0x20   : > { %s393_s7 = scalar_lea.vmem %s392_s6, 256  ;;  %p394_p4 = scmp.lt.s32.totalorder %s589_s29, %s392_s6 }
  0x21   : > { %176 = vperm.xlu0 %386, %v173_v3   ;;  %p389_p1 = pnand %p388_p0, %p551_p3  ;;  %p395_p5 = scmp.lt.s32.totalorder %s393_s7, %s387_s13 }
  0x23   : > { %p390_p2 = pneg %p389_p1  ;;  %p396_p6 = por %p395_p5, %p394_p4 }
  0x25   : > { %186 = vperm.xlu0 %386, %v170_v1   ;;  %p397_p7 = pnand %p396_p6, %p390_p2 }
  0xa0   : > { %v177_v9 = vpop.permute.xlu0 %176 }
  0xa1   : > { %v183_v14 = vmul.f32 %v182_v10, %v177_v9 }
  0xa4   : > { %v187_v13 = vpop.permute.xlu0 %186 }
  0xa5   : > { %v193_v16 = vmul.f32 %v192_v11, %v187_v13 }
  0xa7   : > { %v194_v17 = vadd.f32 %v193_v16, %v183_v14 }
  0xa9   : > { %v199_v18 = vadd.f32 %v198_v15, %v194_v17 }
  0xab   : > { %200 = vst [vmem:[%s161_s28] sm:$0xff] %v199_v18 }
  0xac   : > { %400 = shalt.err (!%p397_p7)
}
  0xad   : > { %s401_s8 = scalar_lea.hbm %s587_s4, 128  ;;  %s405_s21 = scalar_lea.hbm %s642_s2, 512 }
  0xae   : > { %p402_p9 = scmp.ne.s32.totalorder %s587_s4, %s401_s8  ;;  %p406_p12 = scmp.lt.u32.totalorder %s587_s4, %s642_s2 }
  0xaf   : > { %p407_p13 = scmp.lt.u32.totalorder %s405_s21, %s401_s8  ;;  %p409_p1 = scmp.lt.u32.totalorder %s401_s8, %s587_s4 }
  0xb0   : > { %p403_p10 = pnand %p402_p9, %p551_p3 }
  0xb1   : > { %p408_p0 = por %p407_p13, %p406_p12 }
  0xb2   : > { %p404_p11 = pneg %p403_p10 }
  0xb3   : > { %p410_p2 = por %p409_p1, %p408_p0 }
  0xb5   : > { %p411_p4 = pnand %p410_p2, %p404_p11 }
  0xb7   : > { %414 = shalt.err (!%p411_p4)
}
  0xb8   : > { %314 = dma.vmem_to_hbm [thread:$0]  (%p551_p3), %s589_s29, 128, %s587_s4, %s202_s12  }
  0xb9 PF: > { %p320_p5 = scmp.ge.s32.totalorder %s481_s16, 2  ;;  %s229_s26 = sand.u32 1, %s453_s9  }
  0xba   : > { %s230_s28 = scalar_lea.sflag [#allocation3], %s229_s26 }
  0xbb   : > { %p317_p6 = pnand %p320_p5, %p560_p8 }
  0xbd   : > { %448 = dma.done.wait (!%p317_p6), %s230_s28, 128  }
  0xbe   : > { %450 = vsyncadd (!%p317_p6), %s230_s28, 4294967168  ;;  %s15_s16 = sadd.s32 1, %s481_s16   ;;  %s645_s9 = smov %s457_s10 }
  0xbf   : > { %p12_p7 = scmp.ge.s32.totalorder %s15_s16, 6   ;;  %s646_s10 = smov %s461_s11 }
  0xc0   : > { %s647_s11 = smov %s569_s27  ;;  %s648_s12 = smov %s473_s14 }
  0xc1   : > { %s649_s13 = smov %s477_s15  ;;  %s650_s14 = smov %s653_s19 }
  0xc2   : > { %s651_s15 = smov %s657_s20  ;;  %14 = sbr.rel (!%p12_p7) target bundleno = 5 (0x5), region = 66 }
  0xc9   :  { %235 = vsyncpa [#allocation3], 1 }
  0xca   :  { %237 = vsyncpa [#allocation3 + $0x1], 1 }

</bundles_post_ra>
